<compile_context>
chip_gen: v7x
topology: tpu7x:2x2x1
jax: 0.10.0
libtpu: 0.0.40
codegen_flags: <defaults>
</compile_context>

<pallas_src>
import jax
import jax.numpy as jnp
from jax.experimental import pallas as pl
from jax.experimental.pallas import tpu as pltpu


def _round_up(x, m):
    return ((x + m - 1) // m) * m


def _const_spec(block_shape, index_map):
    """Grid-invariant block: request single-buffering when the API supports it."""
    try:
        return pl.BlockSpec(block_shape, index_map, pipeline_mode=pl.Buffered(1))
    except (AttributeError, TypeError):
        return pl.BlockSpec(block_shape, index_map)


def _conv_bn_relu_kernel(x_ref, w_ref, bias_ref, o_ref):
    # x_ref:    (TM, KP)      bf16 -- rows = flattened (n, h); K = concat over ky of
    #                                 the padded input row, zero-padded to KP
    # w_ref:    (KP, W*Cout)  bf16 -- banded 3x3 conv weights, BN scale folded in
    # bias_ref: (1,  W*Cout)  f32  -- folded conv bias + BN shift
    # o_ref:    (TM, W*Cout)
    acc = jnp.dot(x_ref[...], w_ref[...], preferred_element_type=jnp.float32)
    y = jnp.maximum(acc + bias_ref[...], 0.0)          # fused BN shift + ReLU (f32)
    o_ref[...] = y.astype(o_ref.dtype)


def my_backbone_forward(x_nchw, conv_w_oihw, conv_b, bn_gamma, bn_beta,
                        bn_mean, bn_var, eps=1e-5, m_tile=256):
    """Forward pass of MyBackbone. Input/output in NCHW to match PyTorch."""
    N, Cin, H, W = x_nchw.shape
    Cout = conv_w_oihw.shape[0]
    K1 = (W + 2) * Cin                  # per-ky contraction width
    K3 = 3 * K1                         # concatenated contraction width
    KP = _round_up(K3, 128)             # pad K -> clean (16,128) bf16 tiles, no masking
    WC = W * Cout                       # lane-dense output width

    # ---- M tiling: fold N and H into one matmul M dimension ----
    M = N * H
    TM = min(m_tile, _round_up(M, 16))  # small problems: one full-size step
    M_pad = _round_up(M, TM)

    # ---- layout glue (small, fuses into a couple of XLA ops) ----
    x_nhwc = jnp.transpose(x_nchw, (0, 2, 3, 1))                   # NCHW -> NHWC
    x_pad = jnp.pad(x_nhwc, ((0, 0), (1, 1), (1, 1), (0, 0)))      # conv padding=1
    x_rows = x_pad.reshape(N, H + 2, K1).astype(jnp.bfloat16)      # (N, H+2, (W+2)*Cin)
    # Single K-concat of the three ky row shifts (one materialized lhs, one DMA stream).
    x_cat = jnp.concatenate(
        [x_rows[:, 0:H], x_rows[:, 1:H + 1], x_rows[:, 2:H + 2]], axis=-1)
    x_cat = x_cat.reshape(M, K3)
    x_cat = jnp.pad(x_cat, ((0, M_pad - M), (0, KP - K3)))         # (M_pad, KP) bf16

    # ---- banded weight:  w_band[ky, wj*Cin+ci, w*Cout+co]
    #      = W_conv[ky, kx=wj-w, ci, co] if 0 <= wj-w < 3 else 0 ----
    w_hwio = jnp.transpose(conv_w_oihw, (2, 3, 1, 0)).astype(jnp.float32)  # OIHW->HWIO
    d = jnp.arange(W + 2)[:, None] - jnp.arange(W)[None, :]        # (W+2, W): kx index
    in_band = (d >= 0) & (d < 3)
    band = w_hwio[:, jnp.clip(d, 0, 2), :, :]                      # (3, W+2, W, Cin, Cout)
    band = band * in_band[None, :, :, None, None]
    w_band = jnp.transpose(band, (0, 1, 3, 2, 4)).reshape(3, K1, WC)

    # ---- fold BatchNorm (eval) into the weights (f32) and a bias vector ----
    scale = (bn_gamma / jnp.sqrt(bn_var + eps)).astype(jnp.float32)        # (Cout,)
    bias = ((conv_b - bn_mean) * scale + bn_beta).astype(jnp.float32)      # (Cout,)
    scale_t = jnp.tile(scale, (W,))                                        # index w*Cout+co
    w_band = w_band * scale_t[None, None, :]                               # fold scale (f32)
    w_full = w_band.reshape(K3, WC)                                        # ky-major, matches concat
    w_full = jnp.pad(w_full, ((0, KP - K3), (0, 0))).astype(jnp.bfloat16)  # (KP, WC) bf16
    bias_t = jnp.tile(bias, (W,)).reshape(1, WC)                           # (1, WC) f32

    grid = (M_pad // TM,)
    out_flat = pl.pallas_call(
        _conv_bn_relu_kernel,
        out_shape=jax.ShapeDtypeStruct((M_pad, WC), x_nchw.dtype),
        grid_spec=pltpu.PrefetchScalarGridSpec(
            num_scalar_prefetch=0,
            grid=grid,
            in_specs=[
                pl.BlockSpec((TM, KP), lambda m: (m, 0)),
                _const_spec((KP, WC), lambda m: (0, 0)),
                _const_spec((1, WC), lambda m: (0, 0)),
            ],
            out_specs=pl.BlockSpec((TM, WC), lambda m: (m, 0)),
        ),
        compiler_params=pltpu.CompilerParams(
            dimension_semantics=("parallel",)),
    )(x_cat, w_full, bias_t)

    out_nhwc = out_flat[:M].reshape(N, H, W, Cout)                 # drop M padding
    # TODO(synk): keep NHWC (or the flat (M, W*Cout) slab) downstream to avoid this
    # extra HBM round-trip; NCHW kept here only to match the PyTorch contract.
    return jnp.transpose(out_nhwc, (0, 3, 1, 2))                   # NHWC -> NCHW


def _reference(x_nchw, conv_w_oihw, conv_b, bn_gamma, bn_beta, bn_mean, bn_var,
               eps=1e-5):
    # Pure-JAX (f32) reference for a sanity check.
    y = jax.lax.conv_general_dilated(
        x_nchw.astype(jnp.float32), conv_w_oihw.astype(jnp.float32),
        window_strides=(1, 1), padding=((1, 1), (1, 1)),
        dimension_numbers=("NCHW", "OIHW", "NCHW"))
    y = y + conv_b[None, :, None, None]
    y = (y - bn_mean[None, :, None, None]) / jnp.sqrt(
        bn_var[None, :, None, None] + eps)
    y = y * bn_gamma[None, :, None, None] + bn_beta[None, :, None, None]
    return jnp.maximum(y, 0.0)


if __name__ == "__main__":
    # Shapes consistent with the module defaults: batch=2, in_channels=3,
    # out_channels=64, spatial=16.
    N, Cin, Cout, H, W = 2, 3, 64, 16, 16

    key = jax.random.PRNGKey(0)
    kx_key, kw_key = jax.random.split(key)

    x = jax.random.normal(kx_key, (N, Cin, H, W), dtype=jnp.float32)

    # init_weights(): normal_init(conv1, mean=0, std=0.01); bias -> 0
    conv_w = 0.01 * jax.random.normal(kw_key, (Cout, Cin, 3, 3), dtype=jnp.float32)
    conv_b = jnp.zeros((Cout,), jnp.float32)
    # constant_init(norm1, 1): gamma=1, beta=0; fresh running stats: mean=0, var=1
    bn_gamma = jnp.ones((Cout,), jnp.float32)
    bn_beta = jnp.zeros((Cout,), jnp.float32)
    bn_mean = jnp.zeros((Cout,), jnp.float32)
    bn_var = jnp.ones((Cout,), jnp.float32)

    out = my_backbone_forward(x, conv_w, conv_b, bn_gamma, bn_beta,
                              bn_mean, bn_var)
    out = jax.block_until_ready(out)

    ref = _reference(x, conv_w, conv_b, bn_gamma, bn_beta, bn_mean, bn_var)
    assert out.shape == (N, Cout, H, W), out.shape
    # bf16 MXU operands with f32 accumulation -> loosened tolerance vs f32 reference.
    assert jnp.allclose(out, ref, atol=1e-2, rtol=1e-2), \
        float(jnp.max(jnp.abs(out - ref)))

    print("KERNEL_OK")
</pallas_src>

<mosaic_0001>
module attributes {stable_mosaic.version = 11 : i64} {
  func.func @_conv_bn_relu_kernel(%arg0: i32, %arg1: memref<32x256xbf16, #tpu.memory_space<vmem>>, %arg2: memref<256x1024xbf16, #tpu.memory_space<vmem>>, %arg3: memref<1x1024xf32, #tpu.memory_space<vmem>>, %arg4: memref<32x1024xf32, #tpu.memory_space<vmem>>) attributes {dimension_semantics = [#tpu.dimension_semantics<parallel>], iteration_bounds = array<i64: 1>, scalar_prefetch = 0 : i64, scratch_operands = 0 : i64, tpu.core_type = #tpu.core_type<tc>, window_params = [{transform_indices = @transform_0, window_bounds = array<i64: 32, 256>}, {pipeline_mode = #tpu.pipeline_mode<synchronous>, transform_indices = @transform_1, window_bounds = array<i64: 256, 1024>}, {pipeline_mode = #tpu.pipeline_mode<synchronous>, transform_indices = @transform_2, window_bounds = array<i64: 1, 1024>}, {transform_indices = @transform_3, window_bounds = array<i64: 32, 1024>}]} {
    %c0 = arith.constant 0 : index
    %c0_0 = arith.constant 0 : index
    %0 = vector.load %arg1[%c0, %c0_0] : memref<32x256xbf16, #tpu.memory_space<vmem>>, vector<32x256xbf16>
    %c0_1 = arith.constant 0 : index
    %c0_2 = arith.constant 0 : index
    %1 = vector.load %arg2[%c0_1, %c0_2] : memref<256x1024xbf16, #tpu.memory_space<vmem>>, vector<256x1024xbf16>
    %cst = arith.constant dense<0.000000e+00> : vector<32x1024xf32>
    %2 = tpu.matmul %0, %1, %cst {dimension_numbers = #tpu.dot_dimension_numbers<[1], [0], [0], [1], [0, 0, 1, 1], [], []>} : vector<32x256xbf16>, vector<256x1024xbf16>, vector<32x1024xf32> -> vector<32x1024xf32>
    %c0_3 = arith.constant 0 : index
    %c0_4 = arith.constant 0 : index
    %3 = vector.load %arg3[%c0_3, %c0_4] : memref<1x1024xf32, #tpu.memory_space<vmem>>, vector<1x1024xf32>
    %4 = vector.broadcast %3 : vector<1x1024xf32> to vector<32x1024xf32>
    %5 = arith.addf %2, %4 : vector<32x1024xf32>
    %cst_5 = arith.constant 0.000000e+00 : f32
    %6 = vector.broadcast %cst_5 : f32 to vector<32x1024xf32>
    %7 = arith.maximumf %5, %6 : vector<32x1024xf32>
    %c0_6 = arith.constant 0 : index
    %c0_7 = arith.constant 0 : index
    %8 = vector.load %arg4[%c0_6, %c0_7] : memref<32x1024xf32, #tpu.memory_space<vmem>>, vector<32x1024xf32>
    tpu.vector_store %arg4[%c0_6, %c0_7], %7 {strides = array<i32>} : memref<32x1024xf32, #tpu.memory_space<vmem>>, vector<32x1024xf32>,
    return
  }
  func.func @transform_0(%arg0: i32) -> (i32, i32) {
    %c0_i32 = arith.constant 0 : i32
    %c0_i32_0 = arith.constant 0 : i32
    return %arg0, %c0_i32 : i32, i32
  }
  func.func @transform_1(%arg0: i32) -> (i32, i32) {
    %c0_i32 = arith.constant 0 : i32
    %c0_i32_0 = arith.constant 0 : i32
    %c0_i32_1 = arith.constant 0 : i32
    return %c0_i32, %c0_i32_0 : i32, i32
  }
  func.func @transform_2(%arg0: i32) -> (i32, i32) {
    %c0_i32 = arith.constant 0 : i32
    %c0_i32_0 = arith.constant 0 : i32
    %c0_i32_1 = arith.constant 0 : i32
    return %c0_i32, %c0_i32_0 : i32, i32
  }
  func.func @transform_3(%arg0: i32) -> (i32, i32) {
    %c0_i32 = arith.constant 0 : i32
    %c0_i32_0 = arith.constant 0 : i32
    return %arg0, %c0_i32 : i32, i32
  }
}

</mosaic_0001>

<bundles_post_ra>
// kernel: tpu_custom_call.1
= control target key start
LH: loop header
LB: loop body
LE: loop exit
PB: predicated region body
PF: predicated region fallthrough
CT: control target
= control target key end

     0   :  { %8 = vsyncpa [#allocation3], 0  ;;  %s1546_s0 = inlined_call_operand.hbm [shape: bf16[32,256], index: 0, kind: input, shape index: {}]   ;;  %s1547_s1 = inlined_call_operand.hbm [shape: bf16[256,1024], index: 1, kind: input, shape index: {}]   ;;  %s1548_s2 = inlined_call_operand.hbm [shape: f32[1,1024], index: 2, kind: input, shape index: {}]   ;;  %s1549_s3 = inlined_call_operand.hbm [shape: f32[32,1024], index: 3, kind: output, shape index: {}]  }
   0x1   :  { %9 = vsyncpa [#allocation6], 0 }
   0x2   :  { %10 = vsyncpa [#allocation4], 0  ;;  %s1424_s12 = smov [#allocation5]   ;;  %s1330_s16 = scalar_lea.hbm %s1547_s1, 16384 }
   0x3   :  { %s28_s13 = sshll.u32 %s1424_s12, 4  ;;  %p1331_p0 = scmp.ne.s32.totalorder %s1547_s1, %s1330_s16  ;;  %s29_s13 = int_to_ptr.vmem [resolvable:$true] %s28_s13 }
   0x4   :  { %p1334_p1 = scmp.lt.u32.totalorder %s1330_s16, %s1547_s1 }
   0x6   :  { %p1336_p2 = pnand %p1334_p1, %p1331_p0 }
   0x8   :  { %1339 = shalt.err (!%p1336_p2)
}
   0x9   :  { %s1340_s21 = scalar_lea.vmem %s29_s13, 16384  ;;  %p1345_p4 = scmp.lt.s32.totalorder %s29_s13, %s29_s13 }
   0xa   :  { %p1341_p3 = scmp.ne.s32.totalorder %s29_s13, %s1340_s21  ;;  %p1346_p5 = scmp.lt.s32.totalorder %s1340_s21, %s1340_s21 }
   0xc   :  { %p1347_p6 = por %p1346_p5, %p1345_p4 }
   0xe   :  { %p1348_p7 = pnand %p1347_p6, %p1341_p3 }
  0x10   :  { %1351 = shalt.err (!%p1348_p7)
}
  0x11   :  { %s1425_s22 = smov 512   ;;  %s1426_s23 = smov 32  }
  0x12   :  { %34 = dma.hbm_to_vmem [thread:$0]  %s1547_s1, 16384, %s29_s13, [#allocation6], %s1425_s22, %s1425_s22, %s1426_s23  }
  0x13   :  { %s1427_s26 = smov [#allocation2]   ;;  %s1352_s30 = scalar_lea.hbm %s1546_s0, 512 }
  0x14   :  { %s16_s27 = sshll.u32 %s1427_s26, 4  ;;  %p1353_p8 = scmp.ne.s32.totalorder %s1546_s0, %s1352_s30  ;;  %s17_s27 = int_to_ptr.vmem [resolvable:$true] %s16_s27 }
  0x15   :  { %p1356_p9 = scmp.lt.u32.totalorder %s1352_s30, %s1546_s0 }
  0x17   :  { %p1358_p10 = pnand %p1356_p9, %p1353_p8 }
  0x19   :  { %1361 = shalt.err (!%p1358_p10)
}
  0x1a   :  { %s1362_s8 = scalar_lea.vmem %s17_s27, 512  ;;  %p1367_p12 = scmp.lt.s32.totalorder %s17_s27, %s17_s27 }
  0x1b   :  { %p1363_p11 = scmp.ne.s32.totalorder %s17_s27, %s1362_s8  ;;  %p1368_p13 = scmp.lt.s32.totalorder %s1362_s8, %s1362_s8 }
  0x1d   :  { %p1369_p0 = por %p1368_p13, %p1367_p12 }
  0x1f   :  { %p1370_p1 = pnand %p1369_p0, %p1363_p11 }
  0x21   :  { %1373 = shalt.err (!%p1370_p1)
}
  0x22   :  { %s1428_s1 = smov 128   ;;  %s1429_s9 = smov 8  }
  0x23   :  { %22 = dma.hbm_to_vmem [thread:$0]  %s1546_s0, 512, %s17_s27, [#allocation3], %s1428_s1, %s1428_s1, %s1429_s9  }
  0x24   :  { %s1430_s12 = smov [#allocation7]   ;;  %s1374_s16 = scalar_lea.hbm %s1548_s2, 128 }
  0x25   :  { %s41_s13 = sshll.u32 %s1430_s12, 4  ;;  %p1375_p2 = scmp.ne.s32.totalorder %s1548_s2, %s1374_s16  ;;  %s42_s13 = int_to_ptr.vmem [resolvable:$true] %s41_s13 }
  0x26   :  { %p1378_p3 = scmp.lt.u32.totalorder %s1374_s16, %s1548_s2 }
  0x28   :  { %p1380_p4 = pnand %p1378_p3, %p1375_p2 }
  0x2a   :  { %1383 = shalt.err (!%p1380_p4)
}
  0x2b   :  { %s1384_s21 = scalar_lea.vmem %s42_s13, 128  ;;  %p1389_p6 = scmp.lt.s32.totalorder %s42_s13, %s42_s13 }
  0x2c   :  { %p1385_p5 = scmp.ne.s32.totalorder %s42_s13, %s1384_s21  ;;  %p1390_p7 = scmp.lt.s32.totalorder %s1384_s21, %s1384_s21 }
  0x2e   :  { %p1391_p8 = por %p1390_p7, %p1389_p6 }
  0x30   :  { %p1392_p9 = pnand %p1391_p8, %p1385_p5 }
  0x32   :  { %1395 = shalt.err (!%p1392_p9)
}
  0x33   :  { %44 = dma.hbm_to_vmem [thread:$0]  %s1548_s2, 128, %s42_s13, [#allocation6]  }
  0x34   :  { %1418 = dma.done.wait [#allocation3], 512  }
  0x35   :  { %1419 = vsyncadd [#allocation3], 4294966784 }
  0x36   :  { %1420 = dma.done.wait [#allocation6], 16512  }
  0x37   :  { %1421 = vsyncadd [#allocation6], 4294950784  ;;  %v58_v0 = vld [vmem:[#allocation5] sm:$0xff]  ;;  %v59_v2 = vld [vmem:[#allocation5 + $0x8] sm:$0xff]  ;;  %s1431_s2 = smov [#allocation8]  }
  0x38   :  { %v62_v1 = vld [vmem:[#allocation5 + $0x20] sm:$0xff]  ;;  %v63_v4 = vld [vmem:[#allocation5 + $0x28] sm:$0xff]  ;;  %s1169_s23 = sshll.u32 %s1431_s2, 4  ;;  %s1170_s23 = int_to_ptr.vmem [resolvable:$true] %s1169_s23 }
  0x39   :  { %v1187_v3 = vcombine.high %v58_v0, %v62_v1  ;;  %v1186_v5 = vcombine.low %v58_v0, %v62_v1  ;;  %v66_v6 = vld [vmem:[#allocation5 + $0x40] sm:$0xff]  ;;  %v1189_v8 = vcombine.high %v59_v2, %v63_v4  ;;  %v1188_v9 = vcombine.low %v59_v2, %v63_v4  ;;  %v67_v11 = vld [vmem:[#allocation5 + $0x48] sm:$0xff]  ;;  %s1396_s24 = scalar_lea.vmem %s1170_s23, 4096  ;;  %p1401_p11 = scmp.lt.s32.totalorder %s1170_s23, %s1170_s23 }
  0x3a   :  { %v70_v7 = vld [vmem:[#allocation5 + $0x60] sm:$0xff]  ;;  %v71_v12 = vld [vmem:[#allocation5 + $0x68] sm:$0xff]  ;;  %p1397_p10 = scmp.ne.s32.totalorder %s1170_s23, %s1396_s24  ;;  %p1402_p12 = scmp.lt.s32.totalorder %s1396_s24, %s1396_s24 }
  0x3b   :  { %v1195_v10 = vcombine.high %v66_v6, %v70_v7  ;;  %v74_v13 = vld [vmem:[#allocation5 + $0x80] sm:$0xff]  ;;  %888 = vmatprep.subr.bf16.mxu0 %v1187_v3  ;;  %v1197_v14 = vcombine.high %v67_v11, %v71_v12  ;;  %v75_v16 = vld [vmem:[#allocation5 + $0x88] sm:$0xff]  ;;  %941 = vmatprep.subr.bf16.mxu1 %v1189_v8  ;;  %v1194_v18 = vcombine.low %v66_v6, %v70_v7 }
  0x3c   :  { %v78_v15 = vld [vmem:[#allocation5 + $0xa0] sm:$0xff]  ;;  %v79_v17 = vld [vmem:[#allocation5 + $0xa8] sm:$0xff]  ;;  %889 = vmatpush1.bf16.msra.mxu0 %v1186_v5  ;;  %942 = vmatpush1.bf16.msra.mxu1 %v1188_v9  ;;  %v1196_v19 = vcombine.low %v67_v11, %v71_v12  ;;  %p1403_p13 = por %p1402_p12, %p1401_p11 }
  0x3d   :  { %890 = vmatprep.subr.bf16.mxu0 %v1195_v10  ;;  %v1203_v20 = vcombine.high %v74_v13, %v78_v15  ;;  %943 = vmatprep.subr.bf16.mxu1 %v1197_v14  ;;  %v1205_v21 = vcombine.high %v75_v16, %v79_v17  ;;  %v82_v22 = vld [vmem:[#allocation5 + $0xc0] sm:$0xff]  ;;  %v83_v24 = vld [vmem:[#allocation5 + $0xc8] sm:$0xff]  ;;  %v1202_v26 = vcombine.low %v74_v13, %v78_v15 }
  0x3e   :  { %v86_v23 = vld [vmem:[#allocation5 + $0xe0] sm:$0xff]  ;;  %v87_v25 = vld [vmem:[#allocation5 + $0xe8] sm:$0xff]  ;;  %v1204_v27 = vcombine.low %v75_v16, %v79_v17  ;;  %p1404_p0 = pnand %p1403_p13, %p1397_p10 }
  0x3f   :  { %v1211_v28 = vcombine.high %v82_v22, %v86_v23  ;;  %v1213_v29 = vcombine.high %v83_v24, %v87_v25  ;;  %v90_v30 = vld [vmem:[#allocation5 + $0x100] sm:$0xff]  ;;  %v91_v32 = vld [vmem:[#allocation5 + $0x108] sm:$0xff]  ;;  %v1210_v34 = vcombine.low %v82_v22, %v86_v23  ;;  %v1212_v35 = vcombine.low %v83_v24, %v87_v25 }
  0x40   :  { %891 = vmatpush1.bf16.msra.mxu0 %v1194_v18  ;;  %944 = vmatpush1.bf16.msra.mxu1 %v1196_v19  ;;  %v94_v31 = vld [vmem:[#allocation5 + $0x120] sm:$0xff]  ;;  %v95_v33 = vld [vmem:[#allocation5 + $0x128] sm:$0xff] }
  0x41   :  { %892 = vmatprep.subr.bf16.mxu0 %v1203_v20  ;;  %945 = vmatprep.subr.bf16.mxu1 %v1205_v21  ;;  %v1219_v36 = vcombine.high %v90_v30, %v94_v31  ;;  %v1221_v37 = vcombine.high %v91_v32, %v95_v33  ;;  %v98_v38 = vld [vmem:[#allocation5 + $0x140] sm:$0xff]  ;;  %v99_v40 = vld [vmem:[#allocation5 + $0x148] sm:$0xff]  ;;  %v1218_v42 = vcombine.low %v90_v30, %v94_v31 }
  0x42   :  { %v102_v39 = vld [vmem:[#allocation5 + $0x160] sm:$0xff]  ;;  %v103_v41 = vld [vmem:[#allocation5 + $0x168] sm:$0xff]  ;;  %v1220_v43 = vcombine.low %v91_v32, %v95_v33 }
  0x43   :  { %v1227_v44 = vcombine.high %v98_v38, %v102_v39  ;;  %v1229_v45 = vcombine.high %v99_v40, %v103_v41  ;;  %v106_v46 = vld [vmem:[#allocation5 + $0x180] sm:$0xff]  ;;  %v107_v48 = vld [vmem:[#allocation5 + $0x188] sm:$0xff]  ;;  %v1226_v50 = vcombine.low %v98_v38, %v102_v39  ;;  %v1228_v51 = vcombine.low %v99_v40, %v103_v41 }
  0x44   :  { %893 = vmatpush1.bf16.msra.mxu0 %v1202_v26  ;;  %946 = vmatpush1.bf16.msra.mxu1 %v1204_v27  ;;  %v110_v47 = vld [vmem:[#allocation5 + $0x1a0] sm:$0xff]  ;;  %v111_v49 = vld [vmem:[#allocation5 + $0x1a8] sm:$0xff] }
  0x45   :  { %894 = vmatprep.subr.bf16.mxu0 %v1211_v28  ;;  %947 = vmatprep.subr.bf16.mxu1 %v1213_v29  ;;  %v1235_v52 = vcombine.high %v106_v46, %v110_v47  ;;  %v1237_v53 = vcombine.high %v107_v48, %v111_v49  ;;  %v114_v54 = vld [vmem:[#allocation5 + $0x1c0] sm:$0xff]  ;;  %v115_v57 = vld [vmem:[#allocation5 + $0x1c8] sm:$0xff]  ;;  %v1234_v59 = vcombine.low %v106_v46, %v110_v47 }
  0x46   :  { %v118_v55 = vld [vmem:[#allocation5 + $0x1e0] sm:$0xff]  ;;  %v119_v58 = vld [vmem:[#allocation5 + $0x1e8] sm:$0xff]  ;;  %v1236_v60 = vcombine.low %v107_v48, %v111_v49 }
  0x47   :  { %v1490_v56 = vld [vmem:[#allocation2 + $0x4] ss:$8 sps:$4 sm:$0xff]   ;;  %v1243_v61 = vcombine.high %v114_v54, %v118_v55  ;;  %v1245_v62 = vcombine.high %v115_v57, %v119_v58  ;;  %v1242_v3 = vcombine.low %v114_v54, %v118_v55  ;;  %v1244_v4 = vcombine.low %v115_v57, %v119_v58 }
  0x48   :  { %895 = vmatpush1.bf16.msra.mxu0 %v1210_v34  ;;  %948 = vmatpush1.bf16.msra.mxu1 %v1212_v35  ;;  %v122_v63 = vld [vmem:[#allocation5 + $0x200] sm:$0xff]  ;;  %v123_v1 = vld [vmem:[#allocation5 + $0x208] sm:$0xff] }
  0x49   :  { %896 = vmatprep.subr.bf16.mxu0 %v1219_v36  ;;  %949 = vmatprep.subr.bf16.mxu1 %v1221_v37  ;;  %v126_v0 = vld [vmem:[#allocation5 + $0x220] sm:$0xff]  ;;  %v127_v2 = vld [vmem:[#allocation5 + $0x228] sm:$0xff] }
  0x4a   :  { %920 = vmatprep.mubr.bf16.mxu0 %v1490_v56  ;;  %973 = vmatprep.mubr.bf16.mxu1 %v1490_v56  ;;  %v1251_v5 = vcombine.high %v122_v63, %v126_v0  ;;  %v1253_v6 = vcombine.high %v123_v1, %v127_v2  ;;  %v130_v7 = vld [vmem:[#allocation5 + $0x240] sm:$0xff]  ;;  %v131_v9 = vld [vmem:[#allocation5 + $0x248] sm:$0xff]  ;;  %v1250_v11 = vcombine.low %v122_v63, %v126_v0  ;;  %v60_v0 = vld [vmem:[#allocation5 + $0x10] sm:$0xff] }
  0x4b   :  { %v134_v8 = vld [vmem:[#allocation5 + $0x260] sm:$0xff]  ;;  %v135_v10 = vld [vmem:[#allocation5 + $0x268] sm:$0xff]  ;;  %v1252_v12 = vcombine.low %v123_v1, %v127_v2  ;;  %v64_v1 = vld [vmem:[#allocation5 + $0x30] sm:$0xff] }
  0x4c   :  { %897 = vmatpush1.bf16.msra.mxu0 %v1218_v42  ;;  %950 = vmatpush1.bf16.msra.mxu1 %v1220_v43  ;;  %v1259_v13 = vcombine.high %v130_v7, %v134_v8  ;;  %v1261_v14 = vcombine.high %v131_v9, %v135_v10  ;;  %v138_v15 = vld [vmem:[#allocation5 + $0x280] sm:$0xff]  ;;  %v139_v17 = vld [vmem:[#allocation5 + $0x288] sm:$0xff]  ;;  %v1258_v19 = vcombine.low %v130_v7, %v134_v8  ;;  %v61_v2 = vld [vmem:[#allocation5 + $0x18] sm:$0xff] }
  0x4d   :  { %898 = vmatprep.subr.bf16.mxu0 %v1227_v44  ;;  %951 = vmatprep.subr.bf16.mxu1 %v1229_v45  ;;  %v142_v16 = vld [vmem:[#allocation5 + $0x2a0] sm:$0xff]  ;;  %v143_v18 = vld [vmem:[#allocation5 + $0x2a8] sm:$0xff]  ;;  %v1260_v20 = vcombine.low %v131_v9, %v135_v10  ;;  %v68_v8 = vld [vmem:[#allocation5 + $0x50] sm:$0xff] }
  0x4e   :  { %v1267_v21 = vcombine.high %v138_v15, %v142_v16  ;;  %v1269_v22 = vcombine.high %v139_v17, %v143_v18  ;;  %v146_v23 = vld [vmem:[#allocation5 + $0x2c0] sm:$0xff]  ;;  %v147_v25 = vld [vmem:[#allocation5 + $0x2c8] sm:$0xff]  ;;  %v1266_v27 = vcombine.low %v138_v15, %v142_v16  ;;  %v1268_v28 = vcombine.low %v139_v17, %v143_v18  ;;  %v72_v9 = vld [vmem:[#allocation5 + $0x70] sm:$0xff] }
  0x4f   :  { %v150_v24 = vld [vmem:[#allocation5 + $0x2e0] sm:$0xff]  ;;  %v151_v26 = vld [vmem:[#allocation5 + $0x2e8] sm:$0xff]  ;;  %v1199_v15 = vcombine.high %v68_v8, %v72_v9  ;;  %v76_v17 = vld [vmem:[#allocation5 + $0x90] sm:$0xff] }
  0x50   :  { %899 = vmatpush1.bf16.msra.mxu0 %v1226_v50  ;;  %952 = vmatpush1.bf16.msra.mxu1 %v1228_v51  ;;  %v1275_v29 = vcombine.high %v146_v23, %v150_v24  ;;  %v1277_v30 = vcombine.high %v147_v25, %v151_v26  ;;  %v154_v31 = vld [vmem:[#allocation5 + $0x300] sm:$0xff]  ;;  %v155_v33 = vld [vmem:[#allocation5 + $0x308] sm:$0xff]  ;;  %v1274_v35 = vcombine.low %v146_v23, %v150_v24  ;;  %v80_v18 = vld [vmem:[#allocation5 + $0xb0] sm:$0xff] }
  0x51   :  { %900 = vmatprep.subr.bf16.mxu0 %v1235_v52  ;;  %953 = vmatprep.subr.bf16.mxu1 %v1237_v53  ;;  %v158_v32 = vld [vmem:[#allocation5 + $0x320] sm:$0xff]  ;;  %v159_v34 = vld [vmem:[#allocation5 + $0x328] sm:$0xff]  ;;  %v1276_v36 = vcombine.low %v147_v25, %v151_v26  ;;  %v1207_v24 = vcombine.high %v76_v17, %v80_v18  ;;  %v84_v26 = vld [vmem:[#allocation5 + $0xd0] sm:$0xff] }
  0x52   :  { %v1283_v37 = vcombine.high %v154_v31, %v158_v32  ;;  %v1285_v38 = vcombine.high %v155_v33, %v159_v34  ;;  %v162_v39 = vld [vmem:[#allocation5 + $0x340] sm:$0xff]  ;;  %v163_v41 = vld [vmem:[#allocation5 + $0x348] sm:$0xff]  ;;  %v1282_v43 = vcombine.low %v154_v31, %v158_v32  ;;  %v1284_v44 = vcombine.low %v155_v33, %v159_v34 }
  0x53   :  { %v166_v40 = vld [vmem:[#allocation5 + $0x360] sm:$0xff]  ;;  %v167_v42 = vld [vmem:[#allocation5 + $0x368] sm:$0xff]  ;;  %v1206_v31 = vcombine.low %v76_v17, %v80_v18 }
  0x54   :  { %901 = vmatpush1.bf16.msra.mxu0 %v1234_v59  ;;  %954 = vmatpush1.bf16.msra.mxu1 %v1236_v60  ;;  %v1291_v45 = vcombine.high %v162_v39, %v166_v40  ;;  %v1293_v46 = vcombine.high %v163_v41, %v167_v42  ;;  %v170_v47 = vld [vmem:[#allocation5 + $0x380] sm:$0xff]  ;;  %v171_v49 = vld [vmem:[#allocation5 + $0x388] sm:$0xff]  ;;  %v1290_v51 = vcombine.low %v162_v39, %v166_v40 }
  0x55   :  { %902 = vmatprep.subr.bf16.mxu0 %v1243_v61  ;;  %955 = vmatprep.subr.bf16.mxu1 %v1245_v62  ;;  %v174_v48 = vld [vmem:[#allocation5 + $0x3a0] sm:$0xff]  ;;  %v175_v50 = vld [vmem:[#allocation5 + $0x3a8] sm:$0xff]  ;;  %v1292_v52 = vcombine.low %v163_v41, %v167_v42 }
  0x56   :  { %v1299_v53 = vcombine.high %v170_v47, %v174_v48  ;;  %v1301_v54 = vcombine.high %v171_v49, %v175_v50  ;;  %v178_v55 = vld [vmem:[#allocation5 + $0x3c0] sm:$0xff]  ;;  %v179_v58 = vld [vmem:[#allocation5 + $0x3c8] sm:$0xff]  ;;  %v1298_v60 = vcombine.low %v170_v47, %v174_v48  ;;  %v1300_v61 = vcombine.low %v171_v49, %v175_v50 }
  0x57   :  { %v182_v57 = vld [vmem:[#allocation5 + $0x3e0] sm:$0xff]  ;;  %v183_v59 = vld [vmem:[#allocation5 + $0x3e8] sm:$0xff] }
  0x58   :  { %903 = vmatpush1.bf16.msra.mxu0 %v1242_v3  ;;  %956 = vmatpush1.bf16.msra.mxu1 %v1244_v4  ;;  %v1307_v62 = vcombine.high %v178_v55, %v182_v57  ;;  %v1309_v63 = vcombine.high %v179_v58, %v183_v59  ;;  %v65_v3 = vld [vmem:[#allocation5 + $0x38] sm:$0xff]  ;;  %v1306_v4 = vcombine.low %v178_v55, %v182_v57  ;;  %v1494_v10 = vld [vmem:[#allocation2] ss:$8 sps:$4 sm:$0xff]  }
  0x59   :  { %904 = vmatprep.subr.bf16.mxu0 %v1251_v5  ;;  %957 = vmatprep.subr.bf16.mxu1 %v1253_v6  ;;  %v1308_v5 = vcombine.low %v179_v58, %v183_v59  ;;  %v1191_v6 = vcombine.high %v60_v0, %v64_v1  ;;  %v1193_v7 = vcombine.high %v61_v2, %v65_v3  ;;  %v116_v59 = vld [vmem:[#allocation5 + $0x1d0] sm:$0xff] }
  0x5c   :  { %905 = vmatpush1.bf16.msra.mxu0 %v1250_v11  ;;  %958 = vmatpush1.bf16.msra.mxu1 %v1252_v12  ;;  %v69_v11 = vld [vmem:[#allocation5 + $0x58] sm:$0xff] }
  0x5d   :  { %906 = vmatprep.subr.bf16.mxu0 %v1259_v13  ;;  %959 = vmatprep.subr.bf16.mxu1 %v1261_v14  ;;  %v73_v12 = vld [vmem:[#allocation5 + $0x78] sm:$0xff]  ;;  %v1190_v13 = vcombine.low %v60_v0, %v64_v1  ;;  %v1192_v14 = vcombine.low %v61_v2, %v65_v3  ;;  %v124_v3 = vld [vmem:[#allocation5 + $0x210] sm:$0xff] }
  0x5e   :  { %v1201_v16 = vcombine.high %v69_v11, %v73_v12  ;;  %v1200_v23 = vcombine.low %v69_v11, %v73_v12  ;;  %v132_v12 = vld [vmem:[#allocation5 + $0x250] sm:$0xff] }
  0x60   :  { %907 = vmatpush1.bf16.msra.mxu0 %v1258_v19  ;;  %960 = vmatpush1.bf16.msra.mxu1 %v1260_v20  ;;  %v1496_v19 = vld [vmem:[#allocation2 + $0x14] ss:$8 sps:$4 sm:$0xff]  }
  0x61   :  { %908 = vmatprep.subr.bf16.mxu0 %v1267_v21  ;;  %961 = vmatprep.subr.bf16.mxu1 %v1269_v22  ;;  %v77_v20 = vld [vmem:[#allocation5 + $0x98] sm:$0xff]  ;;  %v1198_v22 = vcombine.low %v68_v8, %v72_v9 }
  0x62   :  { %v81_v21 = vld [vmem:[#allocation5 + $0xb8] sm:$0xff] }
  0x63   :  { %v1209_v25 = vcombine.high %v77_v20, %v81_v21  ;;  %v1208_v32 = vcombine.low %v77_v20, %v81_v21  ;;  %v140_v21 = vld [vmem:[#allocation5 + $0x290] sm:$0xff] }
  0x64   :  { %909 = vmatpush1.bf16.msra.mxu0 %v1266_v27  ;;  %962 = vmatpush1.bf16.msra.mxu1 %v1268_v28  ;;  %v88_v27 = vld [vmem:[#allocation5 + $0xf0] sm:$0xff]  ;;  %v85_v28 = vld [vmem:[#allocation5 + $0xd8] sm:$0xff] }
  0x65   :  { %910 = vmatprep.subr.bf16.mxu0 %v1275_v29  ;;  %963 = vmatprep.subr.bf16.mxu1 %v1277_v30  ;;  %v89_v29 = vld [vmem:[#allocation5 + $0xf8] sm:$0xff]  ;;  %v1215_v33 = vcombine.high %v84_v26, %v88_v27  ;;  %v1214_v39 = vcombine.low %v84_v26, %v88_v27 }
  0x66   :  { %v1502_v30 = vld [vmem:[#allocation2 + $0x10] ss:$8 sps:$4 sm:$0xff]   ;;  %v1217_v34 = vcombine.high %v85_v28, %v89_v29  ;;  %v1216_v40 = vcombine.low %v85_v28, %v89_v29 }
  0x67   :  { %v148_v29 = vld [vmem:[#allocation5 + $0x2d0] sm:$0xff] }
  0x68   :  { %911 = vmatpush1.bf16.msra.mxu0 %v1274_v35  ;;  %964 = vmatpush1.bf16.msra.mxu1 %v1276_v36  ;;  %v92_v35 = vld [vmem:[#allocation5 + $0x110] sm:$0xff] }
  0x69   :  { %912 = vmatprep.subr.bf16.mxu0 %v1283_v37  ;;  %965 = vmatprep.subr.bf16.mxu1 %v1285_v38  ;;  %v96_v36 = vld [vmem:[#allocation5 + $0x130] sm:$0xff]  ;;  %v93_v37 = vld [vmem:[#allocation5 + $0x118] sm:$0xff] }
  0x6a   :  { %v97_v38 = vld [vmem:[#allocation5 + $0x138] sm:$0xff]  ;;  %v1223_v41 = vcombine.high %v92_v35, %v96_v36  ;;  %v1222_v47 = vcombine.low %v92_v35, %v96_v36 }
  0x6b   :  { %v1225_v42 = vcombine.high %v93_v37, %v97_v38  ;;  %v1224_v48 = vcombine.low %v93_v37, %v97_v38  ;;  %v156_v38 = vld [vmem:[#allocation5 + $0x310] sm:$0xff] }
  0x6c   :  { %913 = vmatpush1.bf16.msra.mxu0 %v1282_v43  ;;  %966 = vmatpush1.bf16.msra.mxu1 %v1284_v44  ;;  %v100_v43 = vld [vmem:[#allocation5 + $0x150] sm:$0xff] }
  0x6d   :  { %914 = vmatprep.subr.bf16.mxu0 %v1291_v45  ;;  %967 = vmatprep.subr.bf16.mxu1 %v1293_v46  ;;  %v104_v44 = vld [vmem:[#allocation5 + $0x170] sm:$0xff]  ;;  %v101_v45 = vld [vmem:[#allocation5 + $0x158] sm:$0xff] }
  0x6e   :  { %v105_v46 = vld [vmem:[#allocation5 + $0x178] sm:$0xff]  ;;  %v1231_v49 = vcombine.high %v100_v43, %v104_v44  ;;  %v1230_v55 = vcombine.low %v100_v43, %v104_v44 }
  0x6f   :  { %v1233_v50 = vcombine.high %v101_v45, %v105_v46  ;;  %v1232_v57 = vcombine.low %v101_v45, %v105_v46  ;;  %v164_v46 = vld [vmem:[#allocation5 + $0x350] sm:$0xff] }
  0x70   :  { %915 = vmatpush1.bf16.msra.mxu0 %v1290_v51  ;;  %968 = vmatpush1.bf16.msra.mxu1 %v1292_v52  ;;  %v108_v51 = vld [vmem:[#allocation5 + $0x190] sm:$0xff] }
  0x71   :  { %916 = vmatprep.subr.bf16.mxu0 %v1299_v53  ;;  %969 = vmatprep.subr.bf16.mxu1 %v1301_v54  ;;  %v112_v52 = vld [vmem:[#allocation5 + $0x1b0] sm:$0xff]  ;;  %v109_v53 = vld [vmem:[#allocation5 + $0x198] sm:$0xff] }
  0x72   :  { %v113_v54 = vld [vmem:[#allocation5 + $0x1b8] sm:$0xff]  ;;  %v1239_v58 = vcombine.high %v108_v51, %v112_v52 }
  0x73   :  { %v1240_v0 = vcombine.low %v109_v53, %v113_v54 }
  0x74   :  { %917 = vmatpush1.bf16.msra.mxu0 %v1298_v60  ;;  %970 = vmatpush1.bf16.msra.mxu1 %v1300_v61  ;;  %v120_v60 = vld [vmem:[#allocation5 + $0x1f0] sm:$0xff]  ;;  %v117_v61 = vld [vmem:[#allocation5 + $0x1d8] sm:$0xff] }
  0x75   :  { %918 = vmatprep.subr.bf16.mxu0 %v1307_v62  ;;  %971 = vmatprep.subr.bf16.mxu1 %v1309_v63  ;;  %v121_v62 = vld [vmem:[#allocation5 + $0x1f8] sm:$0xff]  ;;  %v1238_v63 = vcombine.low %v108_v51, %v112_v52  ;;  %v1247_v1 = vcombine.high %v116_v59, %v120_v60 }
  0x76   :  { %v1249_v2 = vcombine.high %v117_v61, %v121_v62  ;;  %v1248_v8 = vcombine.low %v117_v61, %v121_v62  ;;  %v180_v62 = vld [vmem:[#allocation5 + $0x3d0] sm:$0xff] }
  0x78   :  { %919 = vmatpush1.bf16.msra.mxu0 %v1306_v4  ;;  %972 = vmatpush1.bf16.msra.mxu1 %v1308_v5  ;;  %v128_v4 = vld [vmem:[#allocation5 + $0x230] sm:$0xff]  ;;  %v125_v5 = vld [vmem:[#allocation5 + $0x218] sm:$0xff] }
  0x79   :  { %994 = vmatprep.subr.bf16.mxu0 %v1191_v6  ;;  %1047 = vmatprep.subr.bf16.mxu1 %v1193_v7  ;;  %v129_v6 = vld [vmem:[#allocation5 + $0x238] sm:$0xff]  ;;  %v1246_v7 = vcombine.low %v116_v59, %v120_v60  ;;  %v1255_v9 = vcombine.high %v124_v3, %v128_v4 }
  0x7a   :  { %v1257_v11 = vcombine.high %v125_v5, %v129_v6  ;;  %v1256_v17 = vcombine.low %v125_v5, %v129_v6 }
  0x7b   :  { %921 = vmatmul.mubr.bf16.vlgmr.msra.gmra.mrb[0].mxu0 %v1494_v10  ;;  %974 = vmatmul.mubr.bf16.vlgmr.msra.gmra.mrb[0].mxu1 %v1494_v10 }
  0x7c   :  { %995 = vmatpush1.bf16.msra.mxu0 %v1190_v13  ;;  %1048 = vmatpush1.bf16.msra.mxu1 %v1192_v14  ;;  %v136_v13 = vld [vmem:[#allocation5 + $0x270] sm:$0xff]  ;;  %v133_v14 = vld [vmem:[#allocation5 + $0x258] sm:$0xff] }
  0x7d   :  { %996 = vmatprep.subr.bf16.mxu0 %v1199_v15  ;;  %1049 = vmatprep.subr.bf16.mxu1 %v1201_v16  ;;  %v137_v15 = vld [vmem:[#allocation5 + $0x278] sm:$0xff]  ;;  %v1254_v16 = vcombine.low %v124_v3, %v128_v4  ;;  %v1263_v18 = vcombine.high %v132_v12, %v136_v13 }
  0x7e   :  { %930 = vmatprep.mubr.bf16.mxu0 %v1496_v19  ;;  %983 = vmatprep.mubr.bf16.mxu1 %v1496_v19  ;;  %v1265_v20 = vcombine.high %v133_v14, %v137_v15  ;;  %v1264_v26 = vcombine.low %v133_v14, %v137_v15 }
  0x80   :  { %997 = vmatpush1.bf16.msra.mxu0 %v1198_v22  ;;  %1050 = vmatpush1.bf16.msra.mxu1 %v1200_v23  ;;  %v144_v22 = vld [vmem:[#allocation5 + $0x2b0] sm:$0xff]  ;;  %v141_v23 = vld [vmem:[#allocation5 + $0x298] sm:$0xff] }
  0x81   :  { %998 = vmatprep.subr.bf16.mxu0 %v1207_v24  ;;  %1051 = vmatprep.subr.bf16.mxu1 %v1209_v25  ;;  %v145_v24 = vld [vmem:[#allocation5 + $0x2b8] sm:$0xff]  ;;  %v1262_v25 = vcombine.low %v132_v12, %v136_v13  ;;  %v1271_v27 = vcombine.high %v140_v21, %v144_v22  ;;  %v1517_v12 = vld [vmem:[#allocation7] sm:$0xff] }
  0x82   :  { %v1273_v28 = vcombine.high %v141_v23, %v145_v24  ;;  %v1272_v35 = vcombine.low %v141_v23, %v145_v24 }
  0x83   :  { %931 = vmatmul.mubr.bf16.gmra.mrb[4].mxu0 %v1502_v30  ;;  %984 = vmatmul.mubr.bf16.gmra.mrb[4].mxu1 %v1502_v30 }
  0x84   :  { %999 = vmatpush1.bf16.msra.mxu0 %v1206_v31  ;;  %1052 = vmatpush1.bf16.msra.mxu1 %v1208_v32  ;;  %v152_v31 = vld [vmem:[#allocation5 + $0x2f0] sm:$0xff]  ;;  %v149_v32 = vld [vmem:[#allocation5 + $0x2d8] sm:$0xff] }
  0x85   :  { %1000 = vmatprep.subr.bf16.mxu0 %v1215_v33  ;;  %1053 = vmatprep.subr.bf16.mxu1 %v1217_v34  ;;  %v153_v33 = vld [vmem:[#allocation5 + $0x2f8] sm:$0xff]  ;;  %v1270_v34 = vcombine.low %v140_v21, %v144_v22  ;;  %v1279_v36 = vcombine.high %v148_v29, %v152_v31 }
  0x86   :  { %1026 = vmatprep.mubr.bf16.mxu0 %v1490_v56  ;;  %1079 = vmatprep.mubr.bf16.mxu1 %v1490_v56  ;;  %v1241_v56 = vcombine.high %v109_v53, %v113_v54  ;;  %v1281_v37 = vcombine.high %v149_v32, %v153_v33  ;;  %v1280_v43 = vcombine.low %v149_v32, %v153_v33  ;;  %v172_v54 = vld [vmem:[#allocation5 + $0x390] sm:$0xff] }
  0x88   :  { %1001 = vmatpush1.bf16.msra.mxu0 %v1214_v39  ;;  %1054 = vmatpush1.bf16.msra.mxu1 %v1216_v40  ;;  %v160_v39 = vld [vmem:[#allocation5 + $0x330] sm:$0xff]  ;;  %v157_v40 = vld [vmem:[#allocation5 + $0x318] sm:$0xff] }
  0x89   :  { %1002 = vmatprep.subr.bf16.mxu0 %v1223_v41  ;;  %1055 = vmatprep.subr.bf16.mxu1 %v1225_v42  ;;  %v161_v41 = vld [vmem:[#allocation5 + $0x338] sm:$0xff]  ;;  %v1278_v42 = vcombine.low %v148_v29, %v152_v31  ;;  %v1287_v44 = vcombine.high %v156_v38, %v160_v39 }
  0x8a   :  { %v1289_v45 = vcombine.high %v157_v40, %v161_v41  ;;  %v1288_v51 = vcombine.low %v157_v40, %v161_v41 }
  0x8c   :  { %1003 = vmatpush1.bf16.msra.mxu0 %v1222_v47  ;;  %1056 = vmatpush1.bf16.msra.mxu1 %v1224_v48  ;;  %v168_v47 = vld [vmem:[#allocation5 + $0x370] sm:$0xff]  ;;  %v165_v48 = vld [vmem:[#allocation5 + $0x358] sm:$0xff] }
  0x8d   :  { %1004 = vmatprep.subr.bf16.mxu0 %v1231_v49  ;;  %1057 = vmatprep.subr.bf16.mxu1 %v1233_v50  ;;  %v169_v49 = vld [vmem:[#allocation5 + $0x378] sm:$0xff]  ;;  %v1286_v50 = vcombine.low %v156_v38, %v160_v39  ;;  %v1295_v52 = vcombine.high %v164_v46, %v168_v47 }
  0x8e   :  { %v1297_v53 = vcombine.high %v165_v48, %v169_v49  ;;  %v1296_v59 = vcombine.low %v165_v48, %v169_v49 }
  0x90   :  { %1005 = vmatpush1.bf16.msra.mxu0 %v1230_v55  ;;  %1058 = vmatpush1.bf16.msra.mxu1 %v1232_v57  ;;  %v176_v55 = vld [vmem:[#allocation5 + $0x3b0] sm:$0xff]  ;;  %v173_v57 = vld [vmem:[#allocation5 + $0x398] sm:$0xff] }
  0x91   :  { %1006 = vmatprep.subr.bf16.mxu0 %v1239_v58  ;;  %1059 = vmatprep.subr.bf16.mxu1 %v1241_v56  ;;  %v177_v58 = vld [vmem:[#allocation5 + $0x3b8] sm:$0xff]  ;;  %v1294_v56 = vcombine.low %v164_v46, %v168_v47  ;;  %v1303_v60 = vcombine.high %v172_v54, %v176_v55 }
  0x92   :  { %v1305_v61 = vcombine.high %v173_v57, %v177_v58  ;;  %v1304_v3 = vcombine.low %v173_v57, %v177_v58 }
  0x94   :  { %1007 = vmatpush1.bf16.msra.mxu0 %v1238_v63  ;;  %1060 = vmatpush1.bf16.msra.mxu1 %v1240_v0  ;;  %v184_v63 = vld [vmem:[#allocation5 + $0x3f0] sm:$0xff]  ;;  %v181_v0 = vld [vmem:[#allocation5 + $0x3d8] sm:$0xff] }
  0x95   :  { %1008 = vmatprep.subr.bf16.mxu0 %v1247_v1  ;;  %1061 = vmatprep.subr.bf16.mxu1 %v1249_v2  ;;  %v185_v1 = vld [vmem:[#allocation5 + $0x3f8] sm:$0xff]  ;;  %v1302_v2 = vcombine.low %v172_v54, %v176_v55  ;;  %v1311_v4 = vcombine.high %v180_v62, %v184_v63  ;;  %v1310_v6 = vcombine.low %v180_v62, %v184_v63 }
  0x96   :  { %v1313_v5 = vcombine.high %v181_v0, %v185_v1 }
  0x98   :  { %1009 = vmatpush1.bf16.msra.mxu0 %v1246_v7  ;;  %1062 = vmatpush1.bf16.msra.mxu1 %v1248_v8  ;;  %v1312_v7 = vcombine.low %v181_v0, %v185_v1  ;;  %v188_v8 = vlaneseq }
  0x99   :  { %1010 = vmatprep.subr.bf16.mxu0 %v1255_v9  ;;  %1063 = vmatprep.subr.bf16.mxu1 %v1257_v11 }
  0x9a   :  { %v1514_v9 = vshrl.u32 %v188_v8, 7 }
  0x9c   :  { %1011 = vmatpush1.bf16.msra.mxu0 %v1254_v16  ;;  %1064 = vmatpush1.bf16.msra.mxu1 %v1256_v17  ;;  %v190_v11 = vsub.s32 0, %v1514_v9  ;;  %v198_v13 = vsub.s32 2, %v1514_v9  ;;  %v194_v14 = vsub.s32 1, %v1514_v9 }
  0x9d   :  { %1012 = vmatprep.subr.bf16.mxu0 %v1263_v18  ;;  %1065 = vmatprep.subr.bf16.mxu1 %v1265_v20 }
  0x9e   :  { %v191_v15 = vrot.slane %v1517_v12, %v190_v11  ;;  %v195_v16 = vrot.slane %v1517_v12, %v194_v14 }
  0xa0   :  { %1013 = vmatpush1.bf16.msra.mxu0 %v1262_v25  ;;  %1066 = vmatpush1.bf16.msra.mxu1 %v1264_v26 }
  0xa1   :  { %1014 = vmatprep.subr.bf16.mxu0 %v1271_v27  ;;  %1067 = vmatprep.subr.bf16.mxu1 %v1273_v28 }
  0xa4   :  { %1015 = vmatpush1.bf16.msra.mxu0 %v1270_v34  ;;  %1068 = vmatpush1.bf16.msra.mxu1 %v1272_v35 }
  0xa5   :  { %1016 = vmatprep.subr.bf16.mxu0 %v1279_v36  ;;  %1069 = vmatprep.subr.bf16.mxu1 %v1281_v37 }
  0xa8   :  { %1017 = vmatpush1.bf16.msra.mxu0 %v1278_v42  ;;  %1070 = vmatpush1.bf16.msra.mxu1 %v1280_v43 }
  0xa9   :  { %1018 = vmatprep.subr.bf16.mxu0 %v1287_v44  ;;  %1071 = vmatprep.subr.bf16.mxu1 %v1289_v45 }
  0xac   :  { %1019 = vmatpush1.bf16.msra.mxu0 %v1286_v50  ;;  %1072 = vmatpush1.bf16.msra.mxu1 %v1288_v51 }
  0xad   :  { %1020 = vmatprep.subr.bf16.mxu0 %v1295_v52  ;;  %1073 = vmatprep.subr.bf16.mxu1 %v1297_v53 }
  0xb0   :  { %1021 = vmatpush1.bf16.msra.mxu0 %v1294_v56  ;;  %1074 = vmatpush1.bf16.msra.mxu1 %v1296_v59 }
  0xb1   :  { %1022 = vmatprep.subr.bf16.mxu0 %v1303_v60  ;;  %1075 = vmatprep.subr.bf16.mxu1 %v1305_v61 }
  0xb4   :  { %1023 = vmatpush1.bf16.msra.mxu0 %v1302_v2  ;;  %1076 = vmatpush1.bf16.msra.mxu1 %v1304_v3  ;;  %v206_v3 = vsub.s32 4, %v1514_v9 }
  0xb5   :  { %1024 = vmatprep.subr.bf16.mxu0 %v1311_v4  ;;  %1077 = vmatprep.subr.bf16.mxu1 %v1313_v5  ;;  %v214_v4 = vsub.s32 6, %v1514_v9  ;;  %v210_v5 = vsub.s32 5, %v1514_v9 }
  0xb7   :  { %v215_v8 = vrot.slane %v1517_v12, %v214_v4  ;;  %v211_v11 = vrot.slane %v1517_v12, %v210_v5 }
  0xb8   :  { %1025 = vmatpush1.bf16.msra.mxu0 %v1310_v6  ;;  %1078 = vmatpush1.bf16.msra.mxu1 %v1312_v7  ;;  %v218_v6 = vsub.s32 7, %v1514_v9  ;;  %v207_v7 = vrot.slane %v1517_v12, %v206_v3 }
  0xbb   :  { %1027 = vmatmul.mubr.bf16.vlgmr.msra.gmra.mrb[8].mxu0 %v1494_v10  ;;  %1080 = vmatmul.mubr.bf16.vlgmr.msra.gmra.mrb[8].mxu1 %v1494_v10  ;;  %v202_v10 = vsub.s32 3, %v1514_v9 }
  0xbc   :  { %1036 = vmatprep.mubr.bf16.mxu0 %v1496_v19  ;;  %1089 = vmatprep.mubr.bf16.mxu1 %v1496_v19  ;;  %v199_v19 = vrot.slane %v1517_v12, %v198_v13  ;;  %v219_v13 = vrot.slane %v1517_v12, %v218_v6 }
  0xc3   :  { %1037 = vmatmul.mubr.bf16.gmra.mrb[12].mxu0 %v1502_v30  ;;  %1090 = vmatmul.mubr.bf16.gmra.mrb[12].mxu1 %v1502_v30  ;;  %v203_v30 = vrot.slane %v1517_v12, %v202_v10 }
 0x14e   :  { %v922_v17 = vpop.f32.mrb[0].mxu0  ;;  %v975_v20 = vpop.f32.mrb[0].mxu1 }
 0x14f   :  { %v923_v18 = vadd.f32 %v922_v17, %v191_v15  ;;  %v924_v21 = vpop.f32.mrb[1].mxu0  ;;  %v976_v22 = vadd.f32 %v975_v20, %v199_v19  ;;  %v977_v24 = vpop.f32.mrb[1].mxu1 }
 0x150   :  { %v925_v23 = vadd.f32 %v924_v21, %v195_v16  ;;  %v926_v25 = vpop.f32.mrb[2].mxu0  ;;  %v978_v27 = vadd.f32 %v977_v24, %v203_v30  ;;  %v979_v29 = vpop.f32.mrb[2].mxu1 }
 0x151   :  { %v1100_v26 = vmax.f32 %v923_v18, 0.0  ;;  %v927_v28 = vadd.f32 %v926_v25, %v191_v15  ;;  %v928_v31 = vpop.f32.mrb[3].mxu0  ;;  %v1102_v32 = vmax.f32 %v976_v22, 0.0  ;;  %v980_v34 = vadd.f32 %v979_v29, %v199_v19  ;;  %v981_v36 = vpop.f32.mrb[3].mxu1 }
 0x152   :  { %v1101_v33 = vmax.f32 %v925_v23, 0.0  ;;  %v929_v35 = vadd.f32 %v928_v31, %v195_v16  ;;  %v1103_v37 = vmax.f32 %v978_v27, 0.0  ;;  %v982_v39 = vadd.f32 %v981_v36, %v203_v30 }
 0x153   :  { %1132 = vst [vmem:[#allocation8] sm:$0xff] %v1100_v26  ;;  %v1108_v38 = vmax.f32 %v927_v28, 0.0  ;;  %1134 = vst [vmem:[#allocation8 + $0x10] sm:$0xff] %v1102_v32  ;;  %v1110_v40 = vmax.f32 %v980_v34, 0.0 }
 0x154   :  { %1133 = vst [vmem:[#allocation8 + $0x8] sm:$0xff] %v1101_v33  ;;  %v1109_v41 = vmax.f32 %v929_v35, 0.0  ;;  %1135 = vst [vmem:[#allocation8 + $0x18] sm:$0xff] %v1103_v37  ;;  %v1111_v42 = vmax.f32 %v982_v39, 0.0 }
 0x155   :  { %1140 = vst [vmem:[#allocation8 + $0x40] sm:$0xff] %v1108_v38  ;;  %1142 = vst [vmem:[#allocation8 + $0x50] sm:$0xff] %v1110_v40 }
 0x156   :  { %1141 = vst [vmem:[#allocation8 + $0x48] sm:$0xff] %v1109_v41  ;;  %v932_v43 = vpop.f32.mrb[4].mxu0  ;;  %1143 = vst [vmem:[#allocation8 + $0x58] sm:$0xff] %v1111_v42  ;;  %v985_v45 = vpop.f32.mrb[4].mxu1 }
 0x157   :  { %v933_v44 = vadd.f32 %v932_v43, %v191_v15  ;;  %v934_v46 = vpop.f32.mrb[5].mxu0  ;;  %v986_v47 = vadd.f32 %v985_v45, %v199_v19  ;;  %v987_v49 = vpop.f32.mrb[5].mxu1 }
 0x158   :  { %v935_v48 = vadd.f32 %v934_v46, %v195_v16  ;;  %v936_v50 = vpop.f32.mrb[6].mxu0  ;;  %v988_v52 = vadd.f32 %v987_v49, %v203_v30  ;;  %v989_v54 = vpop.f32.mrb[6].mxu1 }
 0x159   :  { %v1116_v51 = vmax.f32 %v933_v44, 0.0  ;;  %v937_v53 = vadd.f32 %v936_v50, %v191_v15  ;;  %v938_v55 = vpop.f32.mrb[7].mxu0  ;;  %v1118_v57 = vmax.f32 %v986_v47, 0.0  ;;  %v990_v56 = vadd.f32 %v989_v54, %v199_v19  ;;  %v991_v60 = vpop.f32.mrb[7].mxu1 }
 0x15a   :  { %v1117_v58 = vmax.f32 %v935_v48, 0.0  ;;  %v939_v59 = vadd.f32 %v938_v55, %v195_v16  ;;  %v1119_v61 = vmax.f32 %v988_v52, 0.0  ;;  %v992_v63 = vadd.f32 %v991_v60, %v203_v30 }
 0x15b   :  { %1148 = vst [vmem:[#allocation8 + $0x80] sm:$0xff] %v1116_v51  ;;  %v1124_v62 = vmax.f32 %v937_v53, 0.0  ;;  %1150 = vst [vmem:[#allocation8 + $0x90] sm:$0xff] %v1118_v57  ;;  %v1126_v0 = vmax.f32 %v990_v56, 0.0 }
 0x15c   :  { %1149 = vst [vmem:[#allocation8 + $0x88] sm:$0xff] %v1117_v58  ;;  %v1125_v1 = vmax.f32 %v939_v59, 0.0  ;;  %1151 = vst [vmem:[#allocation8 + $0x98] sm:$0xff] %v1119_v61  ;;  %v1127_v2 = vmax.f32 %v992_v63, 0.0 }
 0x15d   :  { %1156 = vst [vmem:[#allocation8 + $0xc0] sm:$0xff] %v1124_v62  ;;  %1158 = vst [vmem:[#allocation8 + $0xd0] sm:$0xff] %v1126_v0 }
 0x15e   :  { %1157 = vst [vmem:[#allocation8 + $0xc8] sm:$0xff] %v1125_v1  ;;  %1159 = vst [vmem:[#allocation8 + $0xd8] sm:$0xff] %v1127_v2 }
 0x18e   :  { %v1028_v14 = vpop.f32.mrb[8].mxu0  ;;  %v1081_v15 = vpop.f32.mrb[8].mxu1 }
 0x18f   :  { %v1029_v10 = vadd.f32 %v1028_v14, %v207_v7  ;;  %v1030_v19 = vpop.f32.mrb[9].mxu0  ;;  %v1082_v16 = vadd.f32 %v1081_v15, %v215_v8  ;;  %v1083_v17 = vpop.f32.mrb[9].mxu1 }
 0x190   :  { %v1031_v30 = vadd.f32 %v1030_v19, %v211_v11  ;;  %v1032_v18 = vpop.f32.mrb[10].mxu0  ;;  %v1084_v21 = vadd.f32 %v1083_v17, %v219_v13  ;;  %v1085_v9 = vpop.f32.mrb[10].mxu1 }
 0x191   :  { %v1104_v20 = vmax.f32 %v1029_v10, 0.0  ;;  %v1033_v22 = vadd.f32 %v1032_v18, %v207_v7  ;;  %v1034_v23 = vpop.f32.mrb[11].mxu0  ;;  %v1106_v24 = vmax.f32 %v1082_v16, 0.0  ;;  %v1086_v26 = vadd.f32 %v1085_v9, %v215_v8  ;;  %v1087_v28 = vpop.f32.mrb[11].mxu1 }
 0x192   :  { %v1105_v25 = vmax.f32 %v1031_v30, 0.0  ;;  %v1035_v27 = vadd.f32 %v1034_v23, %v211_v11  ;;  %v1107_v12 = vmax.f32 %v1084_v21, 0.0  ;;  %v1088_v31 = vadd.f32 %v1087_v28, %v219_v13 }
 0x193   :  { %1136 = vst [vmem:[#allocation8 + $0x20] sm:$0xff] %v1104_v20  ;;  %v1112_v29 = vmax.f32 %v1033_v22, 0.0  ;;  %1138 = vst [vmem:[#allocation8 + $0x30] sm:$0xff] %v1106_v24  ;;  %v1114_v32 = vmax.f32 %v1086_v26, 0.0 }
 0x194   :  { %1137 = vst [vmem:[#allocation8 + $0x28] sm:$0xff] %v1105_v25  ;;  %v1113_v33 = vmax.f32 %v1035_v27, 0.0  ;;  %1139 = vst [vmem:[#allocation8 + $0x38] sm:$0xff] %v1107_v12  ;;  %v1115_v34 = vmax.f32 %v1088_v31, 0.0 }
 0x195   :  { %1144 = vst [vmem:[#allocation8 + $0x60] sm:$0xff] %v1112_v29  ;;  %1146 = vst [vmem:[#allocation8 + $0x70] sm:$0xff] %v1114_v32 }
 0x196   :  { %1145 = vst [vmem:[#allocation8 + $0x68] sm:$0xff] %v1113_v33  ;;  %v1038_v35 = vpop.f32.mrb[12].mxu0  ;;  %1147 = vst [vmem:[#allocation8 + $0x78] sm:$0xff] %v1115_v34  ;;  %v1091_v37 = vpop.f32.mrb[12].mxu1 }
 0x197   :  { %v1039_v36 = vadd.f32 %v1038_v35, %v207_v7  ;;  %v1040_v38 = vpop.f32.mrb[13].mxu0  ;;  %v1092_v39 = vadd.f32 %v1091_v37, %v215_v8  ;;  %v1093_v41 = vpop.f32.mrb[13].mxu1 }
 0x198   :  { %v1041_v40 = vadd.f32 %v1040_v38, %v211_v11  ;;  %v1042_v42 = vpop.f32.mrb[14].mxu0  ;;  %v1094_v44 = vadd.f32 %v1093_v41, %v219_v13  ;;  %v1095_v46 = vpop.f32.mrb[14].mxu1 }
 0x199   :  { %v1120_v43 = vmax.f32 %v1039_v36, 0.0  ;;  %v1043_v45 = vadd.f32 %v1042_v42, %v207_v7  ;;  %v1044_v47 = vpop.f32.mrb[15].mxu0  ;;  %v1122_v48 = vmax.f32 %v1092_v39, 0.0  ;;  %v1096_v50 = vadd.f32 %v1095_v46, %v215_v8  ;;  %v1097_v52 = vpop.f32.mrb[15].mxu1 }
 0x19a   :  { %v1121_v49 = vmax.f32 %v1041_v40, 0.0  ;;  %v1045_v51 = vadd.f32 %v1044_v47, %v211_v11  ;;  %v1123_v53 = vmax.f32 %v1094_v44, 0.0  ;;  %v1098_v55 = vadd.f32 %v1097_v52, %v219_v13 }
 0x19b   :  { %1152 = vst [vmem:[#allocation8 + $0xa0] sm:$0xff] %v1120_v43  ;;  %v1128_v54 = vmax.f32 %v1043_v45, 0.0  ;;  %1154 = vst [vmem:[#allocation8 + $0xb0] sm:$0xff] %v1122_v48  ;;  %v1130_v57 = vmax.f32 %v1096_v50, 0.0 }
 0x19c   :  { %1153 = vst [vmem:[#allocation8 + $0xa8] sm:$0xff] %v1121_v49  ;;  %v1129_v58 = vmax.f32 %v1045_v51, 0.0  ;;  %1155 = vst [vmem:[#allocation8 + $0xb8] sm:$0xff] %v1123_v53  ;;  %v1131_v56 = vmax.f32 %v1098_v55, 0.0 }
 0x19d   :  { %1160 = vst [vmem:[#allocation8 + $0xe0] sm:$0xff] %v1128_v54  ;;  %1162 = vst [vmem:[#allocation8 + $0xf0] sm:$0xff] %v1130_v57 }
 0x19e   :  { %1161 = vst [vmem:[#allocation8 + $0xe8] sm:$0xff] %v1129_v58  ;;  %1163 = vst [vmem:[#allocation8 + $0xf8] sm:$0xff] %v1131_v56 }
 0x19f   :  { %1407 = shalt.err (!%p1404_p0)
}
 0x1a0   :  { %s1408_s27 = scalar_lea.hbm %s1549_s3, 4096 }
 0x1a1   :  { %p1409_p1 = scmp.ne.s32.totalorder %s1549_s3, %s1408_s27  ;;  %p1412_p2 = scmp.lt.u32.totalorder %s1408_s27, %s1549_s3 }
 0x1a3   :  { %p1414_p3 = pnand %p1412_p2, %p1409_p1 }
 0x1a5   :  { %1417 = shalt.err (!%p1414_p3)
}
 0x1a6   :  { %s1432_s5 = smov 1024   ;;  %s1433_s6 = smov 64  }
 0x1a7   :  { %1175 = dma.vmem_to_hbm [thread:$0]  %s1170_s23, 4096, %s1549_s3, [#allocation4], %s1432_s5, %s1432_s5, %s1433_s6  }
 0x1a8   :  { %1422 = dma.done.wait [#allocation4], 4096  }
 0x1a9   :  { %1423 = vsyncadd [#allocation4], 4294963200 }
 0x1aa   :  { %1179 = vsyncpa [#allocation3], 1 }
 0x1ab   :  { %1180 = vsyncpa [#allocation6], 1 }
 0x1ac   :  { %1181 = vsyncpa [#allocation4], 1 }

</bundles_post_ra>
